<compile_context>
chip_gen: v5e
topology: v5e:2x2
jax: 0.10.0
libtpu: 0.0.40
codegen_flags: <defaults>
</compile_context>

<pallas_src>
import numpy as np
import jax
import jax.numpy as jnp
from jax import lax
from jax.experimental import pallas as pl
from jax.experimental.pallas import tpu as pltpu

# ----------------------------- module constants -----------------------------
M_QUBITS = 4 + 4
LIST_GATES = [(2, 3), (1, 2), (3, 4), (0, 1), (2, 3), (4, 5), (1, 2), (3, 4)]
MODES_DETECTED = [2, 3]
# add1/add2 are module-level globals in the original file (not shown);
# pick 1/1 so that m//2 + add1 + add2 = 6 covers the largest gate index (4,5).
ADD1, ADD2 = 1, 1

I_IN = M_QUBITS // 2                      # 4   -> input image 4x4
I_POOL = M_QUBITS // 4                    # 2   -> pooled image 2x2
DIM_IMG = I_IN * I_IN                     # 16
DIM_POOL = I_POOL * I_POOL                # 4
N_MODES = M_QUBITS // 2 + ADD1 + ADD2     # 6
N_PHOTONS = 2
DIM_FOCK = N_MODES * (N_MODES + 1) // 2   # 21 (2 photons, bunching allowed)

DIM_POOL_PAD = 8
DIM_FOCK_PAD = 32
N_KRAUS = 4
N_OUT = len(MODES_DETECTED)               # 2
OUT_ROWS_PAD = 8                          # sublane-aligned output rows
VEC_DIM = DIM_IMG * DIM_IMG               # 256


# --------------------------- parameter construction --------------------------
def _fock_basis(n_modes):
    return [(a, b) for a in range(n_modes) for b in range(a, n_modes)]


def _givens(dim, p, q, theta):
    g = np.eye(dim)
    c, s = np.cos(theta), np.sin(theta)
    g[p, p] = c
    g[q, q] = c
    g[p, q] = s
    g[q, p] = -s
    return g


def build_conv_unitary():
    # Conv_RBS_density_I2(4, 2): RBS (Givens) rotations coupling neighbouring
    # rows / columns; U = R_row (x) R_col on the I^2 image basis.
    r = np.eye(I_IN)
    for k, (p, q) in enumerate([(0, 1), (2, 3), (1, 2)]):
        r = _givens(I_IN, p, q, 0.20 * (k + 1)) @ r
    c = np.eye(I_IN)
    for k, (p, q) in enumerate([(0, 1), (2, 3), (1, 2)]):
        c = _givens(I_IN, p, q, 0.15 * (k + 1)) @ c
    return np.kron(r, c).astype(np.float32)                      # (16, 16)


def build_pool_kraus():
    # Pooling_2D_density_HW(4, 2): measure-and-discard the intra-block position.
    # K_(a,b)[(i',j'), (i,j)] = 1 iff i//2==i', j//2==j', i%2==a, j%2==b.
    kraus = np.zeros((N_KRAUS, DIM_POOL_PAD, DIM_IMG), np.float32)
    for a in range(2):
        for b in range(2):
            k = 2 * a + b
            for i in range(I_IN):
                for j in range(I_IN):
                    if i % 2 == a and j % 2 == b:
                        kraus[k, (i // 2) * I_POOL + (j // 2), i * I_IN + j] = 1.0
    return kraus                                                  # (4, 8, 16)


def build_tofock_isometry(basis):
    # Basis_Change_Image_to_larger_Fock_density(2, 2, add1, add2):
    # |row i>|col j>  ->  one photon in mode i (rows: 0..1) and one in mode
    # 2+j (cols: 2..3), embedded in the 2-photon / 6-mode Fock space.
    b_iso = np.zeros((DIM_FOCK_PAD, DIM_POOL_PAD), np.float32)
    for i in range(I_POOL):
        for j in range(I_POOL):
            pair = (min(i, I_POOL + j), max(i, I_POOL + j))
            b_iso[basis.index(pair), i * I_POOL + j] = 1.0
    return b_iso                                                  # (32, 8)


def build_vqc_unitary(basis):
    # VQC_Fock_BS_density(2, 6, list_gates): beam-splitter network on 6 modes
    # lifted to the 2-photon Fock space via the permanent formula.
    u1 = np.eye(N_MODES)
    for k, (p, q) in enumerate(LIST_GATES):
        u1 = _givens(N_MODES, p, q, 0.1 * (k + 1)) @ u1
    lifted = np.zeros((DIM_FOCK, DIM_FOCK))
    for i, (c, d) in enumerate(basis):
        for j, (a, b) in enumerate(basis):
            if a != b and c != d:
                v = u1[c, a] * u1[d, b] + u1[c, b] * u1[d, a]
            elif a == b and c != d:
                v = np.sqrt(2.0) * u1[c, a] * u1[d, a]
            elif a != b and c == d:
                v = np.sqrt(2.0) * u1[c, a] * u1[c, b]
            else:
                v = u1[c, a] ** 2
            lifted[i, j] = v
    # zero-pad (not identity-pad): padded Fock rows can never leak energy.
    U = np.zeros((DIM_FOCK_PAD, DIM_FOCK_PAD), np.float32)
    U[:DIM_FOCK, :DIM_FOCK] = lifted
    return U                                                      # (32, 32)


def build_measure_weights(basis):
    # TODO(synk): the exact outcome bookkeeping of Measure_Photon_detection is
    # not in the snippet; here output[k] = Tr[rho * n_hat(modes_detected[k])]
    # (expected photon number in each detected mode).
    mT = np.zeros((DIM_FOCK_PAD, N_OUT), np.float32)
    for f, (a, b) in enumerate(basis):
        for k, mode in enumerate(MODES_DETECTED):
            mT[f, k] = float((a == mode) + (b == mode))
    return mT                                                     # (32, 2)


def build_staged_params():
    basis = _fock_basis(N_MODES)
    return (build_conv_unitary(), build_pool_kraus(),
            build_tofock_isometry(basis), build_vqc_unitary(basis),
            build_measure_weights(basis))


def compose_readout_matrix(params):
    """Fold the whole fixed linear channel into one (8, 256) matrix W8 so that
    out[k, b] = W8[k, :] . vec(rho_b)   (rows 2..7 are zero padding so the
    kernel output tile (8, b_tile) is sublane-aligned and lane-dense).

      out_k = Tr[diag(mT[:,k]) * sum_j A_j rho A_j^T],  A_j = U_vqc B_iso K_j U_conv
            = sum_{p,q} rho[p,q] * (sum_j A_j^T diag(mT[:,k]) A_j)[p,q]
    """
    u_conv, kraus, b_iso, u_vqc, mT = [np.asarray(p, np.float64) for p in params]
    C = u_vqc @ b_iso                                             # (32, 8)
    w = np.zeros((N_OUT, DIM_IMG, DIM_IMG))
    for j in range(N_KRAUS):
        A = C @ kraus[j] @ u_conv                                 # (32, 16)
        for k in range(N_OUT):
            w[k] += A.T @ (mT[:, k:k + 1] * A)                    # A^T diag(mT[:,k]) A
    w8 = np.zeros((OUT_ROWS_PAD, VEC_DIM), np.float32)
    w8[:N_OUT] = w.reshape(N_OUT, VEC_DIM)
    return jnp.asarray(w8)                                        # (8, 256)


# --------------------------------- kernel -----------------------------------
def photonic_qcnn_kernel(w_ref, x_ref, o_ref):
    # (8, 256) x (b_tile, 256) contracted on the 256 dim -> (8, b_tile).
    # Batch lives on the lane axis of the output -> dense, tiny writeback.
    o_ref[...] = lax.dot_general(
        w_ref[...], x_ref[...],
        dimension_numbers=(((1,), (1,)), ((), ())),
        preferred_element_type=jnp.float32)


def _cdiv(a, b):
    return -(-a // b)


def _round_up(x, m):
    return ((x + m - 1) // m) * m


def _choose_tiling(batch, b_tile_max):
    """Pick (b_tile, n_steps, padded_batch).

    - pad batch only to a multiple of 8 (sublane), never to a multiple of a
      fixed huge tile;
    - when the grid has >1 step, make b_tile a multiple of 128 so the
      transposed (8, b_tile) output blocks stay lane-dense;
    - force >=2 (even) grid steps when there is enough work so the 'parallel'
      axis can shard across both v7x TensorCores.
    """
    padded8 = _round_up(max(batch, 1), 8)
    n_steps = _cdiv(padded8, b_tile_max)
    if n_steps == 1 and padded8 >= 2048:
        n_steps = 2                      # feed both TCs on v7x
    if n_steps > 1 and n_steps % 2 == 1:
        n_steps += 1                     # even split across the two cores
    if n_steps > 1:
        b_tile = _round_up(_cdiv(padded8, n_steps), 128)
    else:
        b_tile = padded8
    padded = b_tile * n_steps
    return b_tile, n_steps, padded


def photonic_qcnn_forward(x, w8, *, b_tile_max=4096, compute_dtype=jnp.float32):
    """x: (batch, 16, 16) real density matrices -> (batch, 2).

    compute_dtype=jnp.bfloat16 halves the dominant HBM read stream (inputs);
    accumulation stays f32 on the MXU, but expect ~1e-2 absolute error.
    """
    batch = x.shape[0]
    x_flat = x.reshape(batch, VEC_DIM)                 # row-major, free reshape
    b_tile, n_steps, padded = _choose_tiling(batch, b_tile_max)
    if padded != batch:
        x_flat = jnp.pad(x_flat, ((0, padded - batch), (0, 0)))
    x_flat = x_flat.astype(compute_dtype)
    w8 = w8.astype(compute_dtype)

    out = pl.pallas_call(
        photonic_qcnn_kernel,
        out_shape=jax.ShapeDtypeStruct((OUT_ROWS_PAD, padded), jnp.float32),
        grid_spec=pltpu.PrefetchScalarGridSpec(
            num_scalar_prefetch=0,
            grid=(n_steps,),
            in_specs=[
                # W8: constant block index -> DMA'd once, not per step (8 KiB).
                pl.BlockSpec((OUT_ROWS_PAD, VEC_DIM), lambda i: (0, 0)),
                # x tile: (b_tile, 256) streamed along the batch axis.
                pl.BlockSpec((b_tile, VEC_DIM), lambda i: (i, 0)),
            ],
            # Transposed output: batch on the lane axis, 8 sublanes (2 useful).
            out_specs=pl.BlockSpec((OUT_ROWS_PAD, b_tile), lambda i: (0, i)),
        ),
        compiler_params=pltpu.CompilerParams(dimension_semantics=("parallel",)),
    )(w8, x_flat)
    return out[:N_OUT, :batch].T                       # (batch, 2)


# ------------------------------- reference -----------------------------------
def reference_forward(x, params):
    # Staged (non-composed) float64 reference: Conv -> Pool -> toFock -> VQC
    # -> photon-detection readout (vectorized over the batch).
    u_conv, kraus, b_iso, u_vqc, mT = [np.asarray(p, np.float64) for p in params]
    xs = np.asarray(x, np.float64)
    rho = np.einsum('ip,bpq,jq->bij', u_conv, xs, u_conv)
    pooled = np.einsum('kip,bpq,kjq->bij', kraus, rho, kraus)
    rho_f = np.einsum('ip,bpq,jq->bij', b_iso, pooled, b_iso)
    rho_f = np.einsum('ip,bpq,jq->bij', u_vqc, rho_f, u_vqc)
    diag = np.einsum('bii->bi', rho_f)
    return diag @ mT                                   # (batch, 2)


# ---------------------------------- main -------------------------------------
if __name__ == "__main__":
    params = build_staged_params()
    w8 = compose_readout_matrix(params)

    key = jax.random.PRNGKey(0)
    k1, k2, k3 = jax.random.split(key, 3)

    # -- test 1: small batch of pure-state density matrices ------------------
    batch1 = 2
    v = jax.random.normal(k1, (batch1, DIM_IMG), dtype=jnp.float32)
    v = v / jnp.linalg.norm(v, axis=-1, keepdims=True)
    x1 = jnp.einsum("bi,bj->bij", v, v)                # (2, 16, 16)

    out1 = jax.block_until_ready(photonic_qcnn_forward(x1, w8))
    ref1 = reference_forward(x1, params)
    assert out1.shape == (batch1, N_OUT)
    assert np.allclose(np.asarray(out1), ref1, atol=1e-4), (
        f"max err {np.max(np.abs(np.asarray(out1) - ref1))}")

    # -- test 2: non-multiple-of-8 batch of mixed (non-rank-1) states --------
    batch2 = 10
    vs = jax.random.normal(k2, (batch2, 3, DIM_IMG), dtype=jnp.float32)
    x2 = jnp.einsum("bri,brj->bij", vs, vs)
    x2 = x2 / jnp.trace(x2, axis1=-2, axis2=-1)[:, None, None]

    out2 = jax.block_until_ready(photonic_qcnn_forward(x2, w8))
    ref2 = reference_forward(x2, params)
    assert out2.shape == (batch2, N_OUT)
    assert np.allclose(np.asarray(out2), ref2, atol=1e-4), (
        f"max err {np.max(np.abs(np.asarray(out2) - ref2))}")

    # -- test 3: large batch -> multi-step grid + adaptive (non-wasteful) pad -
    batch3 = 2050
    vs3 = jax.random.normal(k3, (batch3, 3, DIM_IMG), dtype=jnp.float32)
    x3 = jnp.einsum("bri,brj->bij", vs3, vs3)
    x3 = x3 / jnp.trace(x3, axis1=-2, axis2=-1)[:, None, None]

    out3 = jax.block_until_ready(photonic_qcnn_forward(x3, w8))
    ref3 = reference_forward(x3, params)
    assert out3.shape == (batch3, N_OUT)
    assert np.allclose(np.asarray(out3), ref3, atol=1e-4), (
        f"max err {np.max(np.abs(np.asarray(out3) - ref3))}")

    print("KERNEL_OK")
</pallas_src>

<mosaic_0001>
module attributes {stable_mosaic.version = 11 : i64} {
  func.func @photonic_qcnn_kernel(%arg0: i32, %arg1: memref<8x256xf32, #tpu.memory_space<vmem>>, %arg2: memref<8x256xf32, #tpu.memory_space<vmem>>, %arg3: memref<8x8xf32, #tpu.memory_space<vmem>>) attributes {dimension_semantics = [#tpu.dimension_semantics<parallel>], iteration_bounds = array<i64: 1>, scalar_prefetch = 0 : i64, scratch_operands = 0 : i64, tpu.core_type = #tpu.core_type<tc>, window_params = [{pipeline_mode = #tpu.pipeline_mode<synchronous>, transform_indices = @transform_0, window_bounds = array<i64: 8, 256>}, {transform_indices = @transform_1, window_bounds = array<i64: 8, 256>}, {transform_indices = @transform_2, window_bounds = array<i64: 8, 8>}]} {
    %c0 = arith.constant 0 : index
    %c0_0 = arith.constant 0 : index
    %0 = vector.load %arg1[%c0, %c0_0] : memref<8x256xf32, #tpu.memory_space<vmem>>, vector<8x256xf32>
    %c0_1 = arith.constant 0 : index
    %c0_2 = arith.constant 0 : index
    %1 = vector.load %arg2[%c0_1, %c0_2] : memref<8x256xf32, #tpu.memory_space<vmem>>, vector<8x256xf32>
    %cst = arith.constant dense<0.000000e+00> : vector<8x8xf32>
    %2 = tpu.matmul %0, %1, %cst {dimension_numbers = #tpu.dot_dimension_numbers<[1], [1], [0], [0], [0, 0, 1, 0], [], []>} : vector<8x256xf32>, vector<8x256xf32>, vector<8x8xf32> -> vector<8x8xf32>
    %c0_3 = arith.constant 0 : index
    %c0_4 = arith.constant 0 : index
    %3 = vector.load %arg3[%c0_3, %c0_4] : memref<8x8xf32, #tpu.memory_space<vmem>>, vector<8x8xf32>
    tpu.vector_store %arg3[%c0_3, %c0_4], %2 {strides = array<i32>} : memref<8x8xf32, #tpu.memory_space<vmem>>, vector<8x8xf32>,
    return
  }
  func.func @transform_0(%arg0: i32) -> (i32, i32) {
    %c0_i32 = arith.constant 0 : i32
    %c0_i32_0 = arith.constant 0 : i32
    %c0_i32_1 = arith.constant 0 : i32
    return %c0_i32, %c0_i32_0 : i32, i32
  }
  func.func @transform_1(%arg0: i32) -> (i32, i32) {
    %c0_i32 = arith.constant 0 : i32
    %c0_i32_0 = arith.constant 0 : i32
    return %arg0, %c0_i32 : i32, i32
  }
  func.func @transform_2(%arg0: i32) -> (i32, i32) {
    %c0_i32 = arith.constant 0 : i32
    %c0_i32_0 = arith.constant 0 : i32
    return %c0_i32, %arg0 : i32, i32
  }
}

</mosaic_0001>

<bundles_post_ra>
// kernel: tpu_custom_call.1
= control target key start
LH: loop header
LB: loop body
LE: loop exit
PB: predicated region body
PF: predicated region fallthrough
CT: control target
= control target key end

     0   :  { %7 = vsyncpa [#allocation3], 0  ;;  %s212_s0 = inlined_call_operand.hbm [shape: f32[8,256], index: 0, kind: input, shape index: {}]   ;;  %s213_s1 = inlined_call_operand.hbm [shape: f32[8,256], index: 1, kind: input, shape index: {}]   ;;  %s214_s2 = inlined_call_operand.hbm [shape: f32[8,8], index: 2, kind: output, shape index: {}]  }
   0x1   :  { %8 = vsyncpa [#allocation6], 0 }
   0x2   :  { %9 = vsyncpa [#allocation4], 0  ;;  %s15_s11 = sshll.u32 %s212_s0, 4  ;;  %s185_s12 = smov [#allocation2]   ;;  %s16_s11 = int_to_ptr.hbm [resolvable:$true] %s15_s11 }
   0x3   :  { %s17_s13 = sshll.u32 %s185_s12, 4  ;;  %s26_s16 = sshll.u32 %s213_s1, 4  ;;  %s18_s13 = int_to_ptr.vmem [resolvable:$true] %s17_s13  ;;  %s27_s16 = int_to_ptr.hbm [resolvable:$true] %s26_s16 }
   0x4   :  { %20 = dma.hbm_to_vmem [thread:$0]  %s16_s11, 256, %s18_s13, [#allocation3]  }
   0x5   :  { %s186_s17 = smov [#allocation5]  }
   0x6   :  { %s28_s18 = sshll.u32 %s186_s17, 4  ;;  %s29_s18 = int_to_ptr.vmem [resolvable:$true] %s28_s18 }
   0x7   :  { %31 = dma.hbm_to_vmem [thread:$0]  %s27_s16, 256, %s29_s18, [#allocation6]  }
   0x8   :  { %179 = dma.done.wait [#allocation3], 256  }
   0x9   :  { %180 = vsyncadd [#allocation3], 4294967040 }
   0xa   :  { %181 = dma.done.wait [#allocation6], 256  }
   0xb   :  { %182 = vsyncadd [#allocation6], 4294967040  ;;  %v42_v0 = vld [vmem:[#allocation5] sm:$0xff]  ;;  %v43_v1 = vld [vmem:[#allocation5 + $0x8] sm:$0xff]  ;;  %s187_s0 = smov [#allocation7]   ;;  %s93_s21 = sshll.u32 %s214_s2, 4  ;;  %s94_s21 = int_to_ptr.hbm [resolvable:$true] %s93_s21 }
   0xc   :  { %59 = vmatpush.xpose.msra.mxu0 %v42_v0  ;;  %79 = vmatpush.xpose.msra.mxu1 %v43_v1  ;;  %v40_v2 = vld [vmem:[#allocation2] sm:$0xff]  ;;  %v41_v3 = vld [vmem:[#allocation2 + $0x8] sm:$0xff]  ;;  %s91_s1 = sshll.u32 %s187_s0, 4  ;;  %vm84_vm0 = vcmask 64512   ;;  %s92_s1 = int_to_ptr.vmem [resolvable:$true] %s91_s1 }
   0xf   :  { %60 = vmatmul.f32.vlgmr.msra.gmra.mxu0 %v40_v2  ;;  %80 = vmatmul.f32.vlgmr.msra.gmra.mxu1 %v41_v3 }
  0x8c   :  { %v61_v4 = vpop.f32.mrf.mxu0  ;;  %v81_v5 = vpop.f32.mrf.mxu1 }
  0x8d   :  { %v82_v6 = vadd.f32 %v81_v5, %v61_v4 }
  0x8f   :  { %85 = vst.msk [vmem:[#allocation7] sm:$0xff] %vm84_vm0, %v82_v6 }
  0x90   :  { %96 = dma.vmem_to_hbm [thread:$0]  %s92_s1, 128, %s94_s21, [#allocation4]  }
  0x91   :  { %183 = dma.done.wait [#allocation4], 128  }
  0x92   :  { %184 = vsyncadd [#allocation4], 4294967168 }
  0x93   :  { %101 = vsyncpa [#allocation3], 1 }
  0x94   :  { %102 = vsyncpa [#allocation6], 1 }
  0x95   :  { %103 = vsyncpa [#allocation4], 1 }

</bundles_post_ra>
